<compile_context>
chip_gen: v5e
topology: v5e:2x2
jax: 0.10.0
libtpu: 0.0.40
codegen_flags: <defaults>
</compile_context>

<pallas_src>
import jax
import jax.numpy as jnp
from jax.experimental import pallas as pl
from jax.experimental.pallas import tpu as pltpu


_VMEM_BLOCK_BUDGET = 24 * 1024 * 1024  # context double-buffer + f32 intermediates / step


def _round_up(x, m):
    return ((x + m - 1) // m) * m


def fold_proj_weights(w2, w3):
    """Fold proj.Linear1 and proj_v.Linear0 (no nonlinearity in between).

    Call once at parameter-load time; pass the result as `w23=` to avoid an
    O(D^3) matmul + HBM round trip on every forward.
    """
    return jnp.dot(
        w2.astype(jnp.float32), w3.astype(jnp.float32),
        precision=jax.lax.Precision.HIGHEST,
    ).astype(w2.dtype)


def _additive_attention_kernel(x_ref, w1_ref, w23_ref, wv_ref, out_ref, wts_ref):
    """One grid step == tb batch elements.

    x_ref   : [TB, L, D]  context slab
    w1_ref  : [D, D]      proj.Linear0 weight (stored [in, out])
    w23_ref : [D, D]      folded proj.Linear1 @ proj_v.Linear0
    wv_ref  : [1, D]      proj_v.Linear1 weight (row form)
    out_ref : [TB, D]     attended outputs
    wts_ref : [TB, L]     softmax attention weights
    """
    TB, L, D = x_ref.shape
    x = x_ref[...]                                    # [TB, L, D], native dtype

    # ---- the two real projections on the MXU, M = TB*L ----------------------
    x2 = x.reshape(TB * L, D)                         # merge leading dims (minor dim kept)
    tanh_dtype = x.dtype                              # bf16 in -> bf16 EUP tanh (v6e/v7x)
    h = jnp.tanh(jnp.dot(x2, w1_ref[...],
                         preferred_element_type=jnp.float32).astype(tanh_dtype))
    g = jnp.tanh(jnp.dot(h, w23_ref[...],
                         preferred_element_type=jnp.float32).astype(tanh_dtype))
    g3 = g.reshape(TB, L, D)                          # [TB, L, D]

    # ---- scores on the VPU + lane reduction: s[b,l] = sum_d wv[d]*g[b,l,d] --
    wv = wv_ref[...].astype(jnp.float32).reshape(1, 1, D)
    s = jnp.sum(g3 * wv, axis=-1)                     # [TB, L], f32

    # ---- per-row softmax over L ---------------------------------------------
    m = jnp.max(s, axis=-1, keepdims=True)            # [TB, 1]
    e = jnp.exp(s - m)
    den = jnp.sum(e, axis=-1, keepdims=True)
    w = e * pl.reciprocal(den, approx=False)          # [TB, L], f32 (exact recip)
    # NOTE: lane-masked store when L < 128; lane-dense for production L >= 128.
    wts_ref[...] = w.astype(wts_ref.dtype)

    # ---- attended output on VPU + sublane reduction -------------------------
    # out[b,d] = sum_l w[b,l] * x[b,l,d]; f32 accumulation via promotion.
    o = jnp.sum(x * w[:, :, None], axis=1)            # [TB, D], f32
    out_ref[...] = o.astype(out_ref.dtype)


@jax.jit
def _additive_attention_call(context, w1, w23, wv_row):
    B, L, D = context.shape
    in_bytes = context.dtype.itemsize
    w_bytes = w1.dtype.itemsize

    # Batch tile: VMEM-budget driven; >= 2 grid steps once B >= 16 so the
    # "parallel" batch axis shards across both v7x TensorCores.
    per_row = L * D * (2 * in_bytes + 2 * 4) + 2 * (D + L) * 4
    tb_max = max(8, ((_VMEM_BLOCK_BUDGET // per_row) // 8) * 8)
    if B < 16:
        tb = B if B <= tb_max else tb_max
    else:
        tb = min(_round_up(pl.cdiv(B, 2), 8), tb_max)
    n_blocks = pl.cdiv(B, tb)

    # Explicit scoped-VMEM limit (defaults: 16 MiB v5e / 32 MiB v6e, v7x).
    vmem_est = (2 * tb * L * D * in_bytes            # double-buffered context
                + 2 * tb * L * D * 4                 # f32 h / g live values
                + 2 * (2 * D * D + D) * w_bytes      # double-buffered weight blocks
                + 2 * tb * (D + L) * in_bytes)       # double-buffered outputs
    vmem_limit = int(min(128 * 1024 * 1024, max(32 * 1024 * 1024, 2 * vmem_est)))

    cost = pl.CostEstimate(
        flops=4 * B * L * D * D + 4 * B * L * D,
        transcendentals=2 * B * L * D,
        bytes_accessed=(B * L * D + B * D + B * L) * in_bytes
                       + (2 * D * D + D) * w_bytes,
    )

    return pl.pallas_call(
        _additive_attention_kernel,
        out_shape=(
            jax.ShapeDtypeStruct((B, D), context.dtype),
            jax.ShapeDtypeStruct((B, L), context.dtype),
        ),
        grid_spec=pltpu.PrefetchScalarGridSpec(
            num_scalar_prefetch=0,
            grid=(n_blocks,),
            in_specs=[
                pl.BlockSpec((tb, L, D), lambda i: (i, 0, 0)),   # context
                pl.BlockSpec((D, D), lambda i: (0, 0)),          # proj.Linear0
                pl.BlockSpec((D, D), lambda i: (0, 0)),          # folded w2 @ w3
                pl.BlockSpec((1, D), lambda i: (0, 0)),          # proj_v.Linear1
            ],
            out_specs=[
                pl.BlockSpec((tb, D), lambda i: (i, 0)),         # outputs
                pl.BlockSpec((tb, L), lambda i: (i, 0)),         # weights
            ],
        ),
        compiler_params=pltpu.CompilerParams(
            dimension_semantics=("parallel",),
            vmem_limit_bytes=vmem_limit,
        ),
        cost_estimate=cost,
    )(context, w1, w23, wv_row)


def additive_attention(context, w1, w2, w3, wv, bv=None, *, w23=None):
    """context: [B, L, D] -> (outputs [B, D], weights [B, L]).

    Linear weights are stored [in, out] (torch weight.T). `bv` (bias of
    proj_v's final Linear) is accepted for API parity but unused: it is added
    uniformly over the sequence axis before the softmax, so it cannot change
    either output. Pass `w23=fold_proj_weights(w2, w3)` (precomputed once at
    parameter-load time) to skip the per-call fold.
    """
    del bv
    if w23 is None:
        w23 = fold_proj_weights(w2, w3)
    D = context.shape[-1]
    return _additive_attention_call(context, w1, w23, wv.reshape(1, D))


def _reference(context, w1, w2, w3, wv, bv):
    hp = jax.lax.Precision.HIGHEST
    h = jnp.dot(jnp.tanh(jnp.dot(context, w1, precision=hp)), w2, precision=hp)
    s = jnp.dot(jnp.tanh(jnp.dot(h, w3, precision=hp)), wv, precision=hp)[..., 0] + bv[0]
    w = jax.nn.softmax(s, axis=-1)
    out = jnp.einsum("bl,bld->bd", w, context, precision=hp)
    return out, w


if __name__ == "__main__":
    B, L, D = 2, 8, 32   # batch, seq_len, hidden_dim (small, consistent with forward)

    key = jax.random.PRNGKey(0)
    kx, k1, k2, k3, kv, kb = jax.random.split(key, 6)

    # Deterministic parameter init (uniform +-1/sqrt(fan_in), like nn.Linear).
    bound = 1.0 / (D ** 0.5)
    context = jax.random.normal(kx, (B, L, D), dtype=jnp.float32)
    w1 = jax.random.uniform(k1, (D, D), jnp.float32, -bound, bound)
    w2 = jax.random.uniform(k2, (D, D), jnp.float32, -bound, bound)
    w3 = jax.random.uniform(k3, (D, D), jnp.float32, -bound, bound)
    wv = jax.random.uniform(kv, (D, 1), jnp.float32, -bound, bound)
    bv = jax.random.uniform(kb, (1,), jnp.float32, -bound, bound)

    # Fold once at "parameter load" time (weights are static across forwards).
    w23 = fold_proj_weights(w2, w3)

    out, wts = additive_attention(context, w1, w2, w3, wv, bv, w23=w23)
    jax.block_until_ready((out, wts))

    ref_out, ref_wts = _reference(context, w1, w2, w3, wv, bv)
    assert out.shape == (B, D) and wts.shape == (B, L)
    # Tolerance covers MXU f32 matmul pass precision + the (math-exact) w2@w3
    # fold vs. the sequential HIGHEST-precision reference.
    tol = dict(atol=2e-3, rtol=2e-3)
    assert jnp.allclose(out, ref_out, **tol)
    assert jnp.allclose(wts, ref_wts, **tol)
    assert jnp.allclose(jnp.sum(wts, axis=-1), 1.0, atol=1e-3)

    # Multi-block + ragged-batch path: B not a multiple of the batch tile ->
    # Pallas clips the final block (no wrapper-side jnp.pad, no output slices).
    B2 = 20
    ctx2 = jax.random.normal(jax.random.PRNGKey(1), (B2, L, D), dtype=jnp.float32)
    out2, wts2 = additive_attention(ctx2, w1, w2, w3, wv, bv, w23=w23)
    jax.block_until_ready((out2, wts2))
    ref_out2, ref_wts2 = _reference(ctx2, w1, w2, w3, wv, bv)
    assert out2.shape == (B2, D) and wts2.shape == (B2, L)
    assert jnp.allclose(out2, ref_out2, **tol)
    assert jnp.allclose(wts2, ref_wts2, **tol)

    # bf16 smoke test (exercises the bf16-EUP tanh path on v6e/v7x).
    ctx_bf = context.astype(jnp.bfloat16)
    out_bf, wts_bf = additive_attention(
        ctx_bf, w1.astype(jnp.bfloat16), w2, w3, wv.astype(jnp.bfloat16), bv,
        w23=w23.astype(jnp.bfloat16))
    jax.block_until_ready((out_bf, wts_bf))
    assert out_bf.shape == (B, D) and wts_bf.shape == (B, L)
    assert bool(jnp.all(jnp.isfinite(out_bf.astype(jnp.float32))))
    assert jnp.allclose(jnp.sum(wts_bf.astype(jnp.float32), axis=-1), 1.0, atol=2e-2)

    print("KERNEL_OK")
</pallas_src>

<mosaic_0001>
module attributes {stable_mosaic.version = 11 : i64} {
  func.func @_additive_attention_kernel(%arg0: i32, %arg1: memref<2x8x32xf32, #tpu.memory_space<vmem>>, %arg2: memref<32x32xf32, #tpu.memory_space<vmem>>, %arg3: memref<32x32xf32, #tpu.memory_space<vmem>>, %arg4: memref<1x32xf32, #tpu.memory_space<vmem>>, %arg5: memref<2x32xf32, #tpu.memory_space<vmem>>, %arg6: memref<2x8xf32, #tpu.memory_space<vmem>>) attributes {dimension_semantics = [#tpu.dimension_semantics<parallel>], iteration_bounds = array<i64: 1>, scalar_prefetch = 0 : i64, scratch_operands = 0 : i64, tpu.core_type = #tpu.core_type<tc>, window_params = [{transform_indices = @transform_0, window_bounds = array<i64: 2, 8, 32>}, {pipeline_mode = #tpu.pipeline_mode<synchronous>, transform_indices = @transform_1, window_bounds = array<i64: 32, 32>}, {pipeline_mode = #tpu.pipeline_mode<synchronous>, transform_indices = @transform_2, window_bounds = array<i64: 32, 32>}, {pipeline_mode = #tpu.pipeline_mode<synchronous>, transform_indices = @transform_3, window_bounds = array<i64: 1, 32>}, {transform_indices = @transform_4, window_bounds = array<i64: 2, 32>}, {transform_indices = @transform_5, window_bounds = array<i64: 2, 8>}]} {
    %c0 = arith.constant 0 : index
    %c0_0 = arith.constant 0 : index
    %c0_1 = arith.constant 0 : index
    %0 = vector.load %arg1[%c0, %c0_0, %c0_1] : memref<2x8x32xf32, #tpu.memory_space<vmem>>, vector<2x8x32xf32>
    %1 = vector.shape_cast %0 : vector<2x8x32xf32> to vector<16x32xf32>
    %c0_2 = arith.constant 0 : index
    %c0_3 = arith.constant 0 : index
    %2 = vector.load %arg2[%c0_2, %c0_3] : memref<32x32xf32, #tpu.memory_space<vmem>>, vector<32x32xf32>
    %cst = arith.constant dense<0.000000e+00> : vector<16x32xf32>
    %3 = tpu.matmul %1, %2, %cst {dimension_numbers = #tpu.dot_dimension_numbers<[1], [0], [0], [1], [0, 0, 1, 1], [], []>} : vector<16x32xf32>, vector<32x32xf32>, vector<16x32xf32> -> vector<16x32xf32>
    %4 = math.tanh %3 : vector<16x32xf32>
    %c0_4 = arith.constant 0 : index
    %c0_5 = arith.constant 0 : index
    %5 = vector.load %arg3[%c0_4, %c0_5] : memref<32x32xf32, #tpu.memory_space<vmem>>, vector<32x32xf32>
    %cst_6 = arith.constant dense<0.000000e+00> : vector<16x32xf32>
    %6 = tpu.matmul %4, %5, %cst_6 {dimension_numbers = #tpu.dot_dimension_numbers<[1], [0], [0], [1], [0, 0, 1, 1], [], []>} : vector<16x32xf32>, vector<32x32xf32>, vector<16x32xf32> -> vector<16x32xf32>
    %7 = math.tanh %6 : vector<16x32xf32>
    %8 = vector.shape_cast %7 : vector<16x32xf32> to vector<2x8x32xf32>
    %c0_7 = arith.constant 0 : index
    %c0_8 = arith.constant 0 : index
    %9 = vector.load %arg4[%c0_7, %c0_8] : memref<1x32xf32, #tpu.memory_space<vmem>>, vector<1x32xf32>
    %10 = vector.shape_cast %9 : vector<1x32xf32> to vector<1x1x32xf32>
    %11 = vector.broadcast %10 : vector<1x1x32xf32> to vector<2x8x32xf32>
    %12 = arith.mulf %8, %11 : vector<2x8x32xf32>
    %cst_9 = arith.constant dense<0.000000e+00> : vector<2x8xf32>
    %13 = vector.multi_reduction <add>, %12, %cst_9 [2] : vector<2x8x32xf32> to vector<2x8xf32>
    %cst_10 = arith.constant dense<0xFF800000> : vector<2xf32>
    %14 = vector.multi_reduction <maximumf>, %13, %cst_10 [1] : vector<2x8xf32> to vector<2xf32>
    %15 = vector.shape_cast %14 : vector<2xf32> to vector<2x1xf32>
    %16 = vector.broadcast %15 : vector<2x1xf32> to vector<2x8xf32>
    %17 = arith.subf %13, %16 : vector<2x8xf32>
    %18 = math.exp %17 : vector<2x8xf32>
    %cst_11 = arith.constant dense<0.000000e+00> : vector<2xf32>
    %19 = vector.multi_reduction <add>, %18, %cst_11 [1] : vector<2x8xf32> to vector<2xf32>
    %20 = vector.shape_cast %19 : vector<2xf32> to vector<2x1xf32>
    %21 = tpu.reciprocal %20 : vector<2x1xf32> -> vector<2x1xf32>
    %22 = vector.broadcast %21 : vector<2x1xf32> to vector<2x8xf32>
    %23 = arith.mulf %18, %22 : vector<2x8xf32>
    %c0_12 = arith.constant 0 : index
    %c0_13 = arith.constant 0 : index
    %24 = vector.load %arg6[%c0_12, %c0_13] : memref<2x8xf32, #tpu.memory_space<vmem>>, vector<2x8xf32>
    tpu.vector_store %arg6[%c0_12, %c0_13], %23 {strides = array<i32>} : memref<2x8xf32, #tpu.memory_space<vmem>>, vector<2x8xf32>,
    %25 = vector.shape_cast %23 : vector<2x8xf32> to vector<2x8x1xf32>
    %26 = vector.broadcast %25 : vector<2x8x1xf32> to vector<2x8x32xf32>
    %27 = arith.mulf %0, %26 : vector<2x8x32xf32>
    %cst_14 = arith.constant dense<0.000000e+00> : vector<2x32xf32>
    %28 = vector.multi_reduction <add>, %27, %cst_14 [1] : vector<2x8x32xf32> to vector<2x32xf32>
    %c0_15 = arith.constant 0 : index
    %c0_16 = arith.constant 0 : index
    %29 = vector.load %arg5[%c0_15, %c0_16] : memref<2x32xf32, #tpu.memory_space<vmem>>, vector<2x32xf32>
    tpu.vector_store %arg5[%c0_15, %c0_16], %28 {strides = array<i32>} : memref<2x32xf32, #tpu.memory_space<vmem>>, vector<2x32xf32>,
    return
  }
  func.func @transform_0(%arg0: i32) -> (i32, i32, i32) {
    %c0_i32 = arith.constant 0 : i32
    %c0_i32_0 = arith.constant 0 : i32
    %c0_i32_1 = arith.constant 0 : i32
    return %arg0, %c0_i32, %c0_i32_0 : i32, i32, i32
  }
  func.func @transform_1(%arg0: i32) -> (i32, i32) {
    %c0_i32 = arith.constant 0 : i32
    %c0_i32_0 = arith.constant 0 : i32
    %c0_i32_1 = arith.constant 0 : i32
    return %c0_i32, %c0_i32_0 : i32, i32
  }
  func.func @transform_2(%arg0: i32) -> (i32, i32) {
    %c0_i32 = arith.constant 0 : i32
    %c0_i32_0 = arith.constant 0 : i32
    %c0_i32_1 = arith.constant 0 : i32
    return %c0_i32, %c0_i32_0 : i32, i32
  }
  func.func @transform_3(%arg0: i32) -> (i32, i32) {
    %c0_i32 = arith.constant 0 : i32
    %c0_i32_0 = arith.constant 0 : i32
    %c0_i32_1 = arith.constant 0 : i32
    return %c0_i32, %c0_i32_0 : i32, i32
  }
  func.func @transform_4(%arg0: i32) -> (i32, i32) {
    %c0_i32 = arith.constant 0 : i32
    %c0_i32_0 = arith.constant 0 : i32
    return %arg0, %c0_i32 : i32, i32
  }
  func.func @transform_5(%arg0: i32) -> (i32, i32) {
    %c0_i32 = arith.constant 0 : i32
    %c0_i32_0 = arith.constant 0 : i32
    return %arg0, %c0_i32 : i32, i32
  }
}

</mosaic_0001>

<bundles_post_ra>
// kernel: _additive_attention_call.1
= control target key start
LH: loop header
LB: loop body
LE: loop exit
PB: predicated region body
PF: predicated region fallthrough
CT: control target
= control target key end

     0   :  { %11 = vsyncpa [#allocation3], 0  ;;  %s537_s0 = inlined_call_operand.hbm [shape: f32[2,8,32], index: 0, kind: input, shape index: {}]   ;;  %s538_s1 = inlined_call_operand.hbm [shape: f32[32,32], index: 1, kind: input, shape index: {}]   ;;  %s539_s2 = inlined_call_operand.hbm [shape: f32[32,32], index: 2, kind: input, shape index: {}]   ;;  %s540_s3 = inlined_call_operand.vmem [shape: f32[1,32], index: 3, kind: input, shape index: {}]   ;;  %s541_s4 = inlined_call_operand.hbm [shape: f32[2,32], index: 4, kind: output, shape index: {0}]   ;;  %s542_s5 = inlined_call_operand.hbm [shape: f32[2,8], index: 5, kind: output, shape index: {1}]  }
   0x1   :  { %12 = vsyncpa [#allocation6], 0 }
   0x2   :  { %13 = vsyncpa [#allocation4], 0 }
   0x3   :  { %14 = vsyncpa [#allocation10], 0  ;;  %s32_s20 = sshll.u32 %s538_s1, 4  ;;  %s450_s21 = smov [#allocation5]   ;;  %s33_s20 = int_to_ptr.hbm [resolvable:$true] %s32_s20 }
   0x4   :  { %s34_s22 = sshll.u32 %s450_s21, 4  ;;  %s19_s25 = sshll.u32 %s537_s0, 4  ;;  %s35_s22 = int_to_ptr.vmem [resolvable:$true] %s34_s22  ;;  %s20_s25 = int_to_ptr.hbm [resolvable:$true] %s19_s25 }
   0x5   :  { %s451_s26 = smov 128   ;;  %s452_s27 = smov 8  }
   0x6   :  { %40 = dma.hbm_to_vmem [thread:$0]  %s33_s20, 512, %s35_s22, [#allocation6], %s451_s26, %s451_s26, %s452_s27  }
   0x7   :  { %s453_s28 = smov [#allocation2]   ;;  %s45_s7 = sshll.u32 %s539_s2, 4  ;;  %s46_s7 = int_to_ptr.hbm [resolvable:$true] %s45_s7 }
   0x8   :  { %s21_s29 = sshll.u32 %s453_s28, 4  ;;  %s454_s1 = smov [#allocation7]   ;;  %s22_s29 = int_to_ptr.vmem [resolvable:$true] %s21_s29 }
   0x9   :  { %27 = dma.hbm_to_vmem [thread:$0]  %s20_s25, 256, %s22_s29, [#allocation3], %s451_s26, %s451_s26, %s452_s27  }
   0xa   :  { %s47_s8 = sshll.u32 %s454_s1, 4  ;;  %s48_s8 = int_to_ptr.vmem [resolvable:$true] %s47_s8 }
   0xb   :  { %53 = dma.hbm_to_vmem [thread:$0]  %s46_s7, 512, %s48_s8, [#allocation6], %s451_s26, %s451_s26, %s452_s27  }
   0xc   :  { %442 = dma.done.wait [#allocation3], 256  }
   0xd   :  { %443 = vsyncadd [#allocation3], 4294967040 }
   0xe   :  { %444 = dma.done.wait [#allocation6], 1024  }
   0xf   :  { %445 = vsyncadd [#allocation6], 4294966272  ;;  %v73_v0 = vld [vmem:[#allocation5 + $0x18] sm:$0xff]  ;;  %v72_v1 = vld [vmem:[#allocation5 + $0x10] sm:$0xff]  ;;  %vm74_vm0 = vcmask 261120   ;;  %v155_v24 = vlaneseq  ;;  %vm159_vm1 = vcmask 1041409  }
  0x10   :  { %288 = vmatpush.msra.mxu2 %v73_v0  ;;  %93 = vmatpush.msra.mxu0 %v73_v0  ;;  %v71_v2 = vld [vmem:[#allocation5 + $0x8] sm:$0xff]  ;;  %v70_v3 = vld [vmem:[#allocation5] sm:$0xff]  ;;  %v497_v4 = vld [vmem:[#allocation2 + $0x8] sm:$0xff]  ;;  %vm162_vm2 = vcmask 58368   ;;  %v455_v31 = vmov 0   ;;  %s268_s12 = sshll.u32 %s542_s5, 4  ;;  %s269_s12 = int_to_ptr.hbm [resolvable:$true] %s268_s12 }
  0x11   :  { %v499_v5 = vld [vmem:[#allocation2] sm:$0xff]  ;;  %v109_v6 = vld [vmem:[#allocation7 + $0x18] sm:$0xff]  ;;  %v107_v8 = vld [vmem:[#allocation7 + $0x8] sm:$0xff]  ;;  %v512_v25 = vand.u32 127, %v155_v24  ;;  %305 = vset.pattern.permute.xlu2 %v455_v31  ;;  %304 = vset.pattern.permute.xlu1 %v455_v31  ;;  %s457_s5 = smov [#allocation8]   ;;  %s257_s16 = sshll.u32 %s541_s4, 4  ;;  %s258_s16 = int_to_ptr.hbm [resolvable:$true] %s257_s16 }
  0x12   :  { %289 = vmatpush.msra.mxu2 %v72_v1  ;;  %94 = vmatpush.msra.mxu0 %v72_v1  ;;  %v108_v7 = vld [vmem:[#allocation7 + $0x10] sm:$0xff]  ;;  %v106_v9 = vld [vmem:[#allocation7] sm:$0xff]  ;;  %s255_s13 = sshll.u32 %s457_s5, 4  ;;  %vm248_vm7 = vcmask 254976   ;;  %s256_s13 = int_to_ptr.vmem [resolvable:$true] %s255_s13 }
  0x13   :  { %128 = vmatpush.msra.mxu1 %v109_v6  ;;  %292 = vmatpush.msra.mxu3 %v109_v6  ;;  %v307_v15 = vld [vmem:[%s540_s3] ss:$0 sm:$0xff]  ;;  %s456_s3 = smov [#allocation9]  }
  0x14   :  { %290 = vmatpush.msra.mxu2 %v71_v2  ;;  %95 = vmatpush.msra.mxu0 %v71_v2  ;;  %s266_s9 = sshll.u32 %s456_s3, 4  ;;  %s267_s9 = int_to_ptr.vmem [resolvable:$true] %s266_s9 }
  0x15   :  { %129 = vmatpush.msra.mxu1 %v108_v7  ;;  %293 = vmatpush.msra.mxu3 %v108_v7 }
  0x16   :  { %291 = vmatpush.msra.mxu2 %v70_v3  ;;  %96 = vmatpush.msra.mxu0 %v70_v3 }
  0x17   :  { %285 = vmatmul.msk.f32.vlgmr.msra.gmra.mxu2 %vm74_vm0, %v497_v4  ;;  %284 = vmatmul.msk.f32.vlgmr.msra.gmra.mxu0 %vm74_vm0, %v499_v5 }
  0x18   :  { %130 = vmatpush.msra.mxu1 %v107_v8  ;;  %294 = vmatpush.msra.mxu3 %v107_v8 }
  0x19   :  { %306 = vset.pattern.permute.xlu0 %v455_v31 }
  0x1a   :  { %131 = vmatpush.msra.mxu1 %v106_v9  ;;  %295 = vmatpush.msra.mxu3 %v106_v9 }
  0x94   :  { %v98_v10 = vpop.f32.mrf.mxu0 }
  0x95   :  { %308 = vtanh.f32 %v98_v10 }
  0x9a   :  { %v101_v11 = vpop.f32.mrf.mxu2 }
  0x9b   :  { %v309_v12 = vpop.eup %308  ;;  %310 = vtanh.f32 %v101_v11 }
  0x9c   :  { %286 = vmatmul.msk.f32.vlgmr.msra.gmra.mxu1 %vm74_vm0, %v309_v12 }
  0xa1   :  { %v311_v13 = vpop.eup %310 }
  0xa2   :  { %287 = vmatmul.msk.f32.vlgmr.msra.gmra.mxu3 %vm74_vm0, %v311_v13 }
 0x119   :  { %v133_v14 = vpop.f32.mrf.mxu1 }
 0x11a   :  { %312 = vtanh.f32 %v133_v14 }
 0x120   :  { %v313_v16 = vpop.eup %312 }
 0x121   :  { %v145_v17 = vmul.f32 %v313_v16, %v307_v15 }
 0x123   :  { %v147_v18 = vsel %vm74_vm0, %v145_v17, 0.0 }
 0x124   :  { %148 = vadd.xlane.f32.xlu0 %v147_v18 }
 0x125   :  { %v136_v19 = vpop.f32.mrf.mxu3 }
 0x126   :  { %314 = vtanh.f32 %v136_v19 }
 0x12c   :  { %v315_v20 = vpop.eup %314 }
 0x12d   :  { %v146_v21 = vmul.f32 %v315_v20, %v307_v15 }
 0x12f   :  { %v150_v22 = vsel %vm74_vm0, %v146_v21, 0.0 }
 0x130   :  { %151 = vadd.xlane.f32.xlu0 %v150_v22 }
 0x197   :  { %v149_v23 = vpop.xlane.xlu0 %148 }
 0x198   :  { %v157_v27 = vperm.slane %v149_v23, %v512_v25 }
 0x1a3   :  { %v152_v26 = vpop.xlane.xlu0 %151 }
 0x1a4   :  { %v158_v28 = vperm.slane %v152_v26, %v512_v25 }
 0x1a6   :  { %v160_v29 = vsel %vm159_vm1, %v158_v28, %v157_v27 }
 0x1a7   :  { %v163_v30 = vsel %vm162_vm2, %v160_v29, -inf }
 0x1a8   :  { %164 = vmax.xlane.f32.xlu1 %v163_v30 }
 0x21b   :  { %v165_v32 = vpop.xlane.xlu1 %164 }
 0x21c   :  { %v167_v33 = vperm.slane %v165_v32, 0  ;;  %v168_v34 = vperm.slane %v165_v32, 1 }
 0x21e   :  { %v171_v35 = vsub.f32 %v149_v23, %v167_v33  ;;  %v172_v36 = vsub.f32 %v152_v26, %v168_v34 }
 0x220   :  { %v173_v37 = vmul.f32 1.442695, %v171_v35  ;;  %v175_v38 = vmul.f32 1.442695, %v172_v36 }
 0x222   :  { %316 = vpow2.f32 %v173_v37 }
 0x223   :  { %318 = vpow2.f32 %v175_v38 }
 0x228   :  { %v317_v39 = vpop.eup %316 }
 0x229   :  { %v319_v40 = vpop.eup %318  ;;  %180 = vperm.xlu1 %304, %v317_v39  }
 0x22a   :  { %183 = vperm.xlu2 %305, %v319_v40  }
 0x284   :  { %v184_v41 = vpop.permute.xlu2 %183 }
 0x285   :  { %v186_v43 = vperm.slane %v184_v41, %v512_v25 }
 0x29b   :  { %v181_v42 = vpop.permute.xlu1 %180 }
 0x29c   :  { %v185_v44 = vperm.slane %v181_v42, %v512_v25 }
 0x29e   :  { %v187_v45 = vsel %vm159_vm1, %v186_v43, %v185_v44 }
 0x29f   :  { %v189_v46 = vsel %vm162_vm2, %v187_v45, 0.0 }
 0x2a0   :  { %190 = vadd.xlane.f32.xlu2 %v189_v46 }
 0x313   :  { %v191_v47 = vpop.xlane.xlu2 %190 }
 0x314   :  { %320 = vrcp.f32 %v191_v47  ;;  %v203_v51 = vand.u32 2147483648, %v191_v47  ;;  %v201_v53 = vand.u32 2147483647, %v191_v47  ;;  %vm197_vm4 = vweird.f32 %v191_v47 }
 0x316   :  { %v204_v55 = vor.u32 1.1754944e-38, %v203_v51  ;;  %vm202_vm6 = vcmp.eq.f32.partialorder %v201_v53, 8.507059e+37 }
 0x31a   :  { %v321_v48 = vpop.eup %320 }
 0x31b   :  { %v193_v49 = vmul.f32 %v321_v48, %v191_v47  ;;  %vm198_vm3 = vweird.f32 %v321_v48 }
 0x31c   :  { %vm199_vm5 = vmor %vm197_vm4, %vm198_vm3 }
 0x31d   :  { %v194_v50 = vsub.f32 1.0, %v193_v49 }
 0x31f   :  { %v195_v52 = vmul.f32 %v321_v48, %v194_v50 }
 0x321   :  { %v196_v54 = vadd.f32 %v321_v48, %v195_v52 }
 0x323   :  { %v200_v56 = vsel %vm199_vm5, %v321_v48, %v196_v54 }
 0x324   :  { %v205_v57 = vsel %vm202_vm6, %v204_v55, %v200_v56 }
 0x325   :  { %v208_v58 = vperm.slane %v205_v57, 1  ;;  %v207_v59 = vperm.slane %v205_v57, 0 }
 0x327   :  { %v212_v60 = vmul.f32 %v319_v40, %v208_v58  ;;  %v211_v61 = vmul.f32 %v317_v39, %v207_v59 }
 0x329   :  { %219 = vperm.xlu1 %304, %v212_v60   ;;  %216 = vperm.xlu0 %306, %v211_v61  }
 0x39b   :  { %v220_v62 = vpop.permute.xlu1 %219  ;;  %v217_v63 = vpop.permute.xlu0 %216 }
 0x39c   :  { %v222_v0 = vperm.slane %v220_v62, %v512_v25  ;;  %v229_v1 = vmul.f32 %v220_v62, %v497_v4  ;;  %v221_v2 = vperm.slane %v217_v63, %v512_v25  ;;  %v228_v3 = vmul.f32 %v217_v63, %v499_v5 }
 0x39e   :  { %v237_v6 = vsel %vm74_vm0, %v229_v1, 0.0  ;;  %v223_v7 = vsel %vm159_vm1, %v222_v0, %v221_v2  ;;  %v230_v8 = vsel %vm74_vm0, %v228_v3, 0.0 }
 0x39f   :  { %v238_v9 = vrot.slane %v237_v6, 4  ;;  %v231_v10 = vrot.slane %v230_v8, 4  ;;  %225 = vst.msk [vmem:[#allocation9] sm:$0x3] %vm162_vm2, %v223_v7 }
 0x3a0   :  { %271 = dma.vmem_to_hbm [thread:$0]  %s267_s9, 32, %s269_s12, [#allocation10]  }
 0x3a1   :  { %v239_v11 = vadd.f32 %v238_v9, %v237_v6  ;;  %v232_v12 = vadd.f32 %v231_v10, %v230_v8 }
 0x3a3   :  { %v240_v4 = vrot.slane %v239_v11, 2  ;;  %v233_v13 = vrot.slane %v232_v12, 2 }
 0x3a5   :  { %v241_v14 = vadd.f32 %v240_v4, %v239_v11  ;;  %v234_v15 = vadd.f32 %v233_v13, %v232_v12 }
 0x3a7   :  { %v242_v5 = vrot.slane %v241_v14, 1  ;;  %v235_v16 = vrot.slane %v234_v15, 1 }
 0x3a9   :  { %v243_v17 = vadd.f32 %v242_v5, %v241_v14  ;;  %v236_v18 = vadd.f32 %v235_v16, %v234_v15 }
 0x3ab   :  { %v246_v19 = vsel %vm159_vm1, %v243_v17, %v236_v18 }
 0x3ac   :  { %249 = vst.msk [vmem:[#allocation8] sm:$0x3] %vm248_vm7, %v246_v19 }
 0x3ad   :  { %260 = dma.vmem_to_hbm [thread:$0]  %s256_s13, 32, %s258_s16, [#allocation4]  }
 0x3ae   :  { %446 = dma.done.wait [#allocation4], 32  }
 0x3af   :  { %447 = vsyncadd [#allocation4], 4294967264 }
 0x3b0   :  { %448 = dma.done.wait [#allocation10], 32  }
 0x3b1   :  { %449 = vsyncadd [#allocation10], 4294967264 }
 0x3b2   :  { %280 = vsyncpa [#allocation3], 1 }
 0x3b3   :  { %281 = vsyncpa [#allocation6], 1 }
 0x3b4   :  { %282 = vsyncpa [#allocation4], 1 }
 0x3b5   :  { %283 = vsyncpa [#allocation10], 1 }

</bundles_post_ra>
